<compile_context>
chip_gen: v7x
topology: tpu7x:2x2x1
jax: 0.10.0
libtpu: 0.0.40
codegen_flags: <defaults>
</compile_context>

<pallas_src>
import jax
import jax.numpy as jnp
from jax.experimental import pallas as pl
from jax.experimental.pallas import tpu as pltpu


def lstm_fc_kernel(x_ref, wih_ref, whh_ref, b_ref, wfc_ref,
                   o_ref, xb_sc, h_hist):
    """Whole sequence in one kernel invocation (grid=()).

    x_ref   : (T, B_pad)      f32  (input_size==1 -> one scalar per step/row)
    wih_ref : (1, 4H)         f32  W_ih row, fused gate order [i|f|g|o]
    whh_ref : (H, 4H)         f32  W_hh^T, fused lane-dense gate axis
    b_ref   : (1, 4H)         f32  b_ih + b_hh
    wfc_ref : (H, OUT)        f32  W_fc^T
    o_ref   : (T, B_pad) if OUT==1 else (T*B_pad, OUT)
    xb_sc   : (T, B_pad, 4H)  f32  scratch: x*W_ih + b for all steps
    h_hist  : (T*B_pad, H)    f32  scratch: flat h_t history for deferred FC
    """
    T, B = x_ref.shape
    H, H4 = whh_ref.shape

    # ---- Hoisted input projection (+ bias) for all T steps: pure VPU work. --
    x_all = x_ref[...]                                        # (T, B)
    xb_sc[...] = (x_all[:, :, None] * wih_ref[...][None, :, :]
                  + b_ref[...][None, :, :])                   # (T, B, 4H)

    # Loop-invariant fused recurrent weight, hoisted once.
    w_cat = whh_ref[...]                                      # (H, 4H)

    # Lane mask selecting the g-gate block [2H, 3H) of the fused gate axis.
    lane = jax.lax.broadcasted_iota(jnp.int32, (B, H4), 1)
    is_g = jnp.logical_and(lane >= 2 * H, lane < 3 * H)

    h = jnp.zeros((B, H), jnp.float32)
    c = jnp.zeros((B, H), jnp.float32)

    # Full static unroll (T is a trace-time constant).
    # TODO(synk): for T in the hundreds switch to lax.fori_loop(unroll=4..8)
    # with dynamic h_hist indexing to bound code size / vreg pressure.
    for t in range(T):
        # One fused (B,H)@(H,4H) MXU contraction per step on the serial chain.
        pre = xb_sc[t] + jnp.dot(h, w_cat, preferred_element_type=jnp.float32)
        # Full-width activations: 1 sigmoid + 1 tanh over the 128-lane tile.
        act = jnp.where(is_g, jnp.tanh(pre), jax.nn.sigmoid(pre))
        i_g = act[:, 0 * H:1 * H]
        f_g = act[:, 1 * H:2 * H]
        g_g = act[:, 2 * H:3 * H]
        o_g = act[:, 3 * H:4 * H]
        c = f_g * c + i_g * g_g
        h = o_g * jnp.tanh(c)
        h_hist[pl.ds(t * B, B), :] = h                        # static row offset

    # ---- Deferred FC: one (T*B, H) @ (H, OUT) matmul + single writeback. ---
    y = jnp.dot(h_hist[...], wfc_ref[...], preferred_element_type=jnp.float32)
    o_ref[...] = y.reshape(o_ref.shape)


@jax.jit
def net_forward(x, params):
    """x: (T, B) float32 (seq-major, batch_first=False). Matches torch forward."""
    x = jnp.asarray(x, jnp.float32)
    T, B = x.shape
    w_ih, w_hh, b_ih, b_hh, w_fc, b_fc = (
        params["w_ih"], params["w_hh"], params["b_ih"], params["b_hh"],
        params["w_fc"], params["b_fc"])
    H4, IN = w_ih.shape
    H = H4 // 4
    OUT = w_fc.shape[0]
    assert IN == 1, "x.unsqueeze(-1) implies input_size == 1"

    # Pad batch up to the f32 sublane width (8) to avoid masked partial access.
    B_pad = max(8, ((B + 7) // 8) * 8)
    xp = jnp.zeros((T, B_pad), jnp.float32).at[:, :B].set(x)

    # Fused, lane-dense gate layouts ([i|f|g|o] along the 4H lane axis).
    wih_row = w_ih.T.astype(jnp.float32)                      # (1, 4H)
    w_cat = w_hh.T.astype(jnp.float32)                        # (H, 4H): h @ w_cat
    b_row = (b_ih + b_hh).reshape(1, H4).astype(jnp.float32)  # (1, 4H)
    wfc_t = w_fc.T.astype(jnp.float32)                        # (H, OUT)

    # Lane-dense output for the common OUT==1 case; general fallback otherwise.
    out_shape = (T, B_pad) if OUT == 1 else (T * B_pad, OUT)

    # VMEM scratch: T*B_pad*4H*4 + T*B_pad*H*4 bytes (~40 KiB at these shapes).
    # TODO(synk): if H/T are scaled up (H>=1024, T in the thousands) chunk
    # xb_sc over T and set vmem_limit_bytes (v7x physical VMEM is 64 MiB);
    # for large B add a batch grid axis with dimension_semantics=("parallel",).
    out = pl.pallas_call(
        lstm_fc_kernel,
        out_shape=jax.ShapeDtypeStruct(out_shape, jnp.float32),
        in_specs=[pl.BlockSpec(memory_space=pltpu.MemorySpace.VMEM)] * 5,
        out_specs=pl.BlockSpec(memory_space=pltpu.MemorySpace.VMEM),
        scratch_shapes=[
            pltpu.VMEM((T, B_pad, H4), jnp.float32),          # hoisted x*W_ih + b
            pltpu.VMEM((T * B_pad, H), jnp.float32),          # flat h history
        ],
    )(xp, wih_row, w_cat, b_row, wfc_t)

    # b_fc added here (fuses with the padding slice); drop padded batch rows.
    if OUT == 1:
        y_full = (out[:, :B] + b_fc[0])[..., None]            # (T, B, 1)
    else:
        y_full = out.reshape(T, B_pad, OUT)[:, :B, :] + b_fc
    return jnp.squeeze(y_full)                                # torch .squeeze()


def reference_forward(x, params):
    """Pure-JAX reference (PyTorch LSTM + Linear semantics) for validation."""
    w_ih, w_hh, b_ih, b_hh, w_fc, b_fc = (
        params["w_ih"], params["w_hh"], params["b_ih"], params["b_hh"],
        params["w_fc"], params["b_fc"])
    H = w_hh.shape[1]
    T, B = x.shape
    x3 = x[..., None]

    def step(carry, x_t):
        h, c = carry
        gates = x_t @ w_ih.T + b_ih + h @ w_hh.T + b_hh
        i = jax.nn.sigmoid(gates[:, 0 * H:1 * H])
        f = jax.nn.sigmoid(gates[:, 1 * H:2 * H])
        g = jnp.tanh(gates[:, 2 * H:3 * H])
        o = jax.nn.sigmoid(gates[:, 3 * H:4 * H])
        c = f * c + i * g
        h = o * jnp.tanh(c)
        return (h, c), h

    h0 = jnp.zeros((B, H), jnp.float32)
    _, hs = jax.lax.scan(step, (h0, h0), x3)                  # (T, B, H)
    y = hs @ w_fc.T + b_fc
    return jnp.squeeze(y)


def init_params(key, input_size, hidden_size, out_features):
    """Deterministic PyTorch-style uniform init."""
    ks = jax.random.split(key, 6)
    k_lstm = 1.0 / jnp.sqrt(hidden_size)
    k_fc = 1.0 / jnp.sqrt(hidden_size)
    u = lambda k, shape, s: jax.random.uniform(k, shape, jnp.float32, -s, s)
    return {
        "w_ih": u(ks[0], (4 * hidden_size, input_size), k_lstm),
        "w_hh": u(ks[1], (4 * hidden_size, hidden_size), k_lstm),
        "b_ih": u(ks[2], (4 * hidden_size,), k_lstm),
        "b_hh": u(ks[3], (4 * hidden_size,), k_lstm),
        "w_fc": u(ks[4], (out_features, hidden_size), k_fc),
        "b_fc": u(ks[5], (out_features,), k_fc),
    }


if __name__ == "__main__":
    INPUT_SIZE = 1      # implied by x.unsqueeze(-1)
    HIDDEN = 32
    OUT_FEATURES = 1
    T, B = 8, 2         # seq len, batch (seq-major, batch_first=False)

    key = jax.random.PRNGKey(0)
    k_x, k_p = jax.random.split(key)
    x = jax.random.normal(k_x, (T, B), jnp.float32)
    params = init_params(k_p, INPUT_SIZE, HIDDEN, OUT_FEATURES)

    y = net_forward(x, params)
    jax.block_until_ready(y)

    y_ref = reference_forward(x, params)
    assert y.shape == y_ref.shape == (T, B), (y.shape, y_ref.shape)
    assert jnp.allclose(y, y_ref, atol=1e-5, rtol=1e-5), "mismatch vs reference"

    print("KERNEL_OK")
</pallas_src>

<mosaic_0001>
module attributes {stable_mosaic.version = 11 : i64} {
  func.func @lstm_fc_kernel(%arg0: memref<8x8xf32, #tpu.memory_space<vmem>>, %arg1: memref<1x128xf32, #tpu.memory_space<vmem>>, %arg2: memref<32x128xf32, #tpu.memory_space<vmem>>, %arg3: memref<1x128xf32, #tpu.memory_space<vmem>>, %arg4: memref<32x1xf32, #tpu.memory_space<vmem>>, %arg5: memref<8x8xf32, #tpu.memory_space<vmem>>, %arg6: memref<8x8x128xf32, #tpu.memory_space<vmem>>, %arg7: memref<64x32xf32, #tpu.memory_space<vmem>>) attributes {dimension_semantics = [], scalar_prefetch = 0 : i64, scratch_operands = 2 : i64, tpu.core_type = #tpu.core_type<tc>} {
    %c0 = arith.constant 0 : index
    %c0_0 = arith.constant 0 : index
    %0 = vector.load %arg0[%c0, %c0_0] : memref<8x8xf32, #tpu.memory_space<vmem>>, vector<8x8xf32>
    %1 = vector.shape_cast %0 : vector<8x8xf32> to vector<8x8x1xf32>
    %c0_1 = arith.constant 0 : index
    %c0_2 = arith.constant 0 : index
    %2 = vector.load %arg1[%c0_1, %c0_2] : memref<1x128xf32, #tpu.memory_space<vmem>>, vector<1x128xf32>
    %3 = vector.shape_cast %2 : vector<1x128xf32> to vector<1x1x128xf32>
    %4 = vector.broadcast %1 : vector<8x8x1xf32> to vector<8x8x128xf32>
    %5 = vector.broadcast %3 : vector<1x1x128xf32> to vector<8x8x128xf32>
    %6 = arith.mulf %4, %5 : vector<8x8x128xf32>
    %c0_3 = arith.constant 0 : index
    %c0_4 = arith.constant 0 : index
    %7 = vector.load %arg3[%c0_3, %c0_4] : memref<1x128xf32, #tpu.memory_space<vmem>>, vector<1x128xf32>
    %8 = vector.shape_cast %7 : vector<1x128xf32> to vector<1x1x128xf32>
    %9 = vector.broadcast %8 : vector<1x1x128xf32> to vector<8x8x128xf32>
    %10 = arith.addf %6, %9 : vector<8x8x128xf32>
    %c0_5 = arith.constant 0 : index
    %c0_6 = arith.constant 0 : index
    %c0_7 = arith.constant 0 : index
    %11 = vector.load %arg6[%c0_5, %c0_6, %c0_7] : memref<8x8x128xf32, #tpu.memory_space<vmem>>, vector<8x8x128xf32>
    tpu.vector_store %arg6[%c0_5, %c0_6, %c0_7], %10 {strides = array<i32>} : memref<8x8x128xf32, #tpu.memory_space<vmem>>, vector<8x8x128xf32>,
    %c0_8 = arith.constant 0 : index
    %c0_9 = arith.constant 0 : index
    %12 = vector.load %arg2[%c0_8, %c0_9] : memref<32x128xf32, #tpu.memory_space<vmem>>, vector<32x128xf32>
    %13 = tpu.iota {dimensions = array<i32: 1>} : vector<8x128xi32>
    %c64_i32 = arith.constant 64 : i32
    %14 = vector.broadcast %c64_i32 : i32 to vector<8x128xi32>
    %15 = arith.cmpi sge, %13, %14 : vector<8x128xi32>
    %c96_i32 = arith.constant 96 : i32
    %16 = vector.broadcast %c96_i32 : i32 to vector<8x128xi32>
    %17 = arith.cmpi slt, %13, %16 : vector<8x128xi32>
    %18 = arith.andi %15, %17 : vector<8x128xi1>
    %cst = arith.constant 0.000000e+00 : f32
    %19 = vector.broadcast %cst : f32 to vector<8x32xf32>
    %cst_10 = arith.constant 0.000000e+00 : f32
    %20 = vector.broadcast %cst_10 : f32 to vector<8x32xf32>
    %c0_11 = arith.constant 0 : index
    %c0_12 = arith.constant 0 : index
    %c0_13 = arith.constant 0 : index
    %21 = vector.load %arg6[%c0_11, %c0_12, %c0_13] : memref<8x8x128xf32, #tpu.memory_space<vmem>>, vector<1x8x128xf32>
    %22 = vector.shape_cast %21 : vector<1x8x128xf32> to vector<8x128xf32>
    %cst_14 = arith.constant dense<0.000000e+00> : vector<8x128xf32>
    %23 = tpu.matmul %19, %12, %cst_14 {dimension_numbers = #tpu.dot_dimension_numbers<[1], [0], [0], [1], [0, 0, 1, 1], [], []>} : vector<8x32xf32>, vector<32x128xf32>, vector<8x128xf32> -> vector<8x128xf32>
    %24 = arith.addf %22, %23 : vector<8x128xf32>
    %25 = math.tanh %24 : vector<8x128xf32>
    %26 = arith.negf %24 : vector<8x128xf32>
    %27 = math.exp %26 : vector<8x128xf32>
    %cst_15 = arith.constant 1.000000e+00 : f32
    %28 = vector.broadcast %cst_15 : f32 to vector<8x128xf32>
    %29 = arith.addf %28, %27 : vector<8x128xf32>
    %30 = arith.divf %28, %29 : vector<8x128xf32>
    %31 = arith.select %18, %25, %30 : vector<8x128xi1>, vector<8x128xf32>
    %32 = vector.extract_strided_slice %31 {offsets = [0, 0], sizes = [8, 32], strides = [1, 1]} : vector<8x128xf32> to vector<8x32xf32>
    %33 = vector.extract_strided_slice %31 {offsets = [0, 32], sizes = [8, 32], strides = [1, 1]} : vector<8x128xf32> to vector<8x32xf32>
    %34 = vector.extract_strided_slice %31 {offsets = [0, 64], sizes = [8, 32], strides = [1, 1]} : vector<8x128xf32> to vector<8x32xf32>
    %35 = vector.extract_strided_slice %31 {offsets = [0, 96], sizes = [8, 32], strides = [1, 1]} : vector<8x128xf32> to vector<8x32xf32>
    %36 = arith.mulf %33, %20 : vector<8x32xf32>
    %37 = arith.mulf %32, %34 : vector<8x32xf32>
    %38 = arith.addf %36, %37 : vector<8x32xf32>
    %39 = math.tanh %38 : vector<8x32xf32>
    %40 = arith.mulf %35, %39 : vector<8x32xf32>
    %c0_16 = arith.constant 0 : index
    %c0_17 = arith.constant 0 : index
    %41 = vector.load %arg7[%c0_16, %c0_17] : memref<64x32xf32, #tpu.memory_space<vmem>>, vector<8x32xf32>
    tpu.vector_store %arg7[%c0_16, %c0_17], %40 {strides = array<i32>} : memref<64x32xf32, #tpu.memory_space<vmem>>, vector<8x32xf32>,
    %c1 = arith.constant 1 : index
    %c0_18 = arith.constant 0 : index
    %c0_19 = arith.constant 0 : index
    %42 = vector.load %arg6[%c1, %c0_18, %c0_19] : memref<8x8x128xf32, #tpu.memory_space<vmem>>, vector<1x8x128xf32>
    %43 = vector.shape_cast %42 : vector<1x8x128xf32> to vector<8x128xf32>
    %cst_20 = arith.constant dense<0.000000e+00> : vector<8x128xf32>
    %44 = tpu.matmul %40, %12, %cst_20 {dimension_numbers = #tpu.dot_dimension_numbers<[1], [0], [0], [1], [0, 0, 1, 1], [], []>} : vector<8x32xf32>, vector<32x128xf32>, vector<8x128xf32> -> vector<8x128xf32>
    %45 = arith.addf %43, %44 : vector<8x128xf32>
    %46 = math.tanh %45 : vector<8x128xf32>
    %47 = arith.negf %45 : vector<8x128xf32>
    %48 = math.exp %47 : vector<8x128xf32>
    %cst_21 = arith.constant 1.000000e+00 : f32
    %49 = vector.broadcast %cst_21 : f32 to vector<8x128xf32>
    %50 = arith.addf %49, %48 : vector<8x128xf32>
    %51 = arith.divf %49, %50 : vector<8x128xf32>
    %52 = arith.select %18, %46, %51 : vector<8x128xi1>, vector<8x128xf32>
    %53 = vector.extract_strided_slice %52 {offsets = [0, 0], sizes = [8, 32], strides = [1, 1]} : vector<8x128xf32> to vector<8x32xf32>
    %54 = vector.extract_strided_slice %52 {offsets = [0, 32], sizes = [8, 32], strides = [1, 1]} : vector<8x128xf32> to vector<8x32xf32>
    %55 = vector.extract_strided_slice %52 {offsets = [0, 64], sizes = [8, 32], strides = [1, 1]} : vector<8x128xf32> to vector<8x32xf32>
    %56 = vector.extract_strided_slice %52 {offsets = [0, 96], sizes = [8, 32], strides = [1, 1]} : vector<8x128xf32> to vector<8x32xf32>
    %57 = arith.mulf %54, %38 : vector<8x32xf32>
    %58 = arith.mulf %53, %55 : vector<8x32xf32>
    %59 = arith.addf %57, %58 : vector<8x32xf32>
    %60 = math.tanh %59 : vector<8x32xf32>
    %61 = arith.mulf %56, %60 : vector<8x32xf32>
    %c8 = arith.constant 8 : index
    %c0_22 = arith.constant 0 : index
    %62 = vector.load %arg7[%c8, %c0_22] : memref<64x32xf32, #tpu.memory_space<vmem>>, vector<8x32xf32>
    tpu.vector_store %arg7[%c8, %c0_22], %61 {strides = array<i32>} : memref<64x32xf32, #tpu.memory_space<vmem>>, vector<8x32xf32>,
    %c2 = arith.constant 2 : index
    %c0_23 = arith.constant 0 : index
    %c0_24 = arith.constant 0 : index
    %63 = vector.load %arg6[%c2, %c0_23, %c0_24] : memref<8x8x128xf32, #tpu.memory_space<vmem>>, vector<1x8x128xf32>
    %64 = vector.shape_cast %63 : vector<1x8x128xf32> to vector<8x128xf32>
    %cst_25 = arith.constant dense<0.000000e+00> : vector<8x128xf32>
    %65 = tpu.matmul %61, %12, %cst_25 {dimension_numbers = #tpu.dot_dimension_numbers<[1], [0], [0], [1], [0, 0, 1, 1], [], []>} : vector<8x32xf32>, vector<32x128xf32>, vector<8x128xf32> -> vector<8x128xf32>
    %66 = arith.addf %64, %65 : vector<8x128xf32>
    %67 = math.tanh %66 : vector<8x128xf32>
    %68 = arith.negf %66 : vector<8x128xf32>
    %69 = math.exp %68 : vector<8x128xf32>
    %cst_26 = arith.constant 1.000000e+00 : f32
    %70 = vector.broadcast %cst_26 : f32 to vector<8x128xf32>
    %71 = arith.addf %70, %69 : vector<8x128xf32>
    %72 = arith.divf %70, %71 : vector<8x128xf32>
    %73 = arith.select %18, %67, %72 : vector<8x128xi1>, vector<8x128xf32>
    %74 = vector.extract_strided_slice %73 {offsets = [0, 0], sizes = [8, 32], strides = [1, 1]} : vector<8x128xf32> to vector<8x32xf32>
    %75 = vector.extract_strided_slice %73 {offsets = [0, 32], sizes = [8, 32], strides = [1, 1]} : vector<8x128xf32> to vector<8x32xf32>
    %76 = vector.extract_strided_slice %73 {offsets = [0, 64], sizes = [8, 32], strides = [1, 1]} : vector<8x128xf32> to vector<8x32xf32>
    %77 = vector.extract_strided_slice %73 {offsets = [0, 96], sizes = [8, 32], strides = [1, 1]} : vector<8x128xf32> to vector<8x32xf32>
    %78 = arith.mulf %75, %59 : vector<8x32xf32>
    %79 = arith.mulf %74, %76 : vector<8x32xf32>
    %80 = arith.addf %78, %79 : vector<8x32xf32>
    %81 = math.tanh %80 : vector<8x32xf32>
    %82 = arith.mulf %77, %81 : vector<8x32xf32>
    %c16 = arith.constant 16 : index
    %c0_27 = arith.constant 0 : index
    %83 = vector.load %arg7[%c16, %c0_27] : memref<64x32xf32, #tpu.memory_space<vmem>>, vector<8x32xf32>
    tpu.vector_store %arg7[%c16, %c0_27], %82 {strides = array<i32>} : memref<64x32xf32, #tpu.memory_space<vmem>>, vector<8x32xf32>,
    %c3 = arith.constant 3 : index
    %c0_28 = arith.constant 0 : index
    %c0_29 = arith.constant 0 : index
    %84 = vector.load %arg6[%c3, %c0_28, %c0_29] : memref<8x8x128xf32, #tpu.memory_space<vmem>>, vector<1x8x128xf32>
    %85 = vector.shape_cast %84 : vector<1x8x128xf32> to vector<8x128xf32>
    %cst_30 = arith.constant dense<0.000000e+00> : vector<8x128xf32>
    %86 = tpu.matmul %82, %12, %cst_30 {dimension_numbers = #tpu.dot_dimension_numbers<[1], [0], [0], [1], [0, 0, 1, 1], [], []>} : vector<8x32xf32>, vector<32x128xf32>, vector<8x128xf32> -> vector<8x128xf32>
    %87 = arith.addf %85, %86 : vector<8x128xf32>
    %88 = math.tanh %87 : vector<8x128xf32>
    %89 = arith.negf %87 : vector<8x128xf32>
    %90 = math.exp %89 : vector<8x128xf32>
    %cst_31 = arith.constant 1.000000e+00 : f32
    %91 = vector.broadcast %cst_31 : f32 to vector<8x128xf32>
    %92 = arith.addf %91, %90 : vector<8x128xf32>
    %93 = arith.divf %91, %92 : vector<8x128xf32>
    %94 = arith.select %18, %88, %93 : vector<8x128xi1>, vector<8x128xf32>
    %95 = vector.extract_strided_slice %94 {offsets = [0, 0], sizes = [8, 32], strides = [1, 1]} : vector<8x128xf32> to vector<8x32xf32>
    %96 = vector.extract_strided_slice %94 {offsets = [0, 32], sizes = [8, 32], strides = [1, 1]} : vector<8x128xf32> to vector<8x32xf32>
    %97 = vector.extract_strided_slice %94 {offsets = [0, 64], sizes = [8, 32], strides = [1, 1]} : vector<8x128xf32> to vector<8x32xf32>
    %98 = vector.extract_strided_slice %94 {offsets = [0, 96], sizes = [8, 32], strides = [1, 1]} : vector<8x128xf32> to vector<8x32xf32>
    %99 = arith.mulf %96, %80 : vector<8x32xf32>
    %100 = arith.mulf %95, %97 : vector<8x32xf32>
    %101 = arith.addf %99, %100 : vector<8x32xf32>
    %102 = math.tanh %101 : vector<8x32xf32>
    %103 = arith.mulf %98, %102 : vector<8x32xf32>
    %c24 = arith.constant 24 : index
    %c0_32 = arith.constant 0 : index
    %104 = vector.load %arg7[%c24, %c0_32] : memref<64x32xf32, #tpu.memory_space<vmem>>, vector<8x32xf32>
    tpu.vector_store %arg7[%c24, %c0_32], %103 {strides = array<i32>} : memref<64x32xf32, #tpu.memory_space<vmem>>, vector<8x32xf32>,
    %c4 = arith.constant 4 : index
    %c0_33 = arith.constant 0 : index
    %c0_34 = arith.constant 0 : index
    %105 = vector.load %arg6[%c4, %c0_33, %c0_34] : memref<8x8x128xf32, #tpu.memory_space<vmem>>, vector<1x8x128xf32>
    %106 = vector.shape_cast %105 : vector<1x8x128xf32> to vector<8x128xf32>
    %cst_35 = arith.constant dense<0.000000e+00> : vector<8x128xf32>
    %107 = tpu.matmul %103, %12, %cst_35 {dimension_numbers = #tpu.dot_dimension_numbers<[1], [0], [0], [1], [0, 0, 1, 1], [], []>} : vector<8x32xf32>, vector<32x128xf32>, vector<8x128xf32> -> vector<8x128xf32>
    %108 = arith.addf %106, %107 : vector<8x128xf32>
    %109 = math.tanh %108 : vector<8x128xf32>
    %110 = arith.negf %108 : vector<8x128xf32>
    %111 = math.exp %110 : vector<8x128xf32>
    %cst_36 = arith.constant 1.000000e+00 : f32
    %112 = vector.broadcast %cst_36 : f32 to vector<8x128xf32>
    %113 = arith.addf %112, %111 : vector<8x128xf32>
    %114 = arith.divf %112, %113 : vector<8x128xf32>
    %115 = arith.select %18, %109, %114 : vector<8x128xi1>, vector<8x128xf32>
    %116 = vector.extract_strided_slice %115 {offsets = [0, 0], sizes = [8, 32], strides = [1, 1]} : vector<8x128xf32> to vector<8x32xf32>
    %117 = vector.extract_strided_slice %115 {offsets = [0, 32], sizes = [8, 32], strides = [1, 1]} : vector<8x128xf32> to vector<8x32xf32>
    %118 = vector.extract_strided_slice %115 {offsets = [0, 64], sizes = [8, 32], strides = [1, 1]} : vector<8x128xf32> to vector<8x32xf32>
    %119 = vector.extract_strided_slice %115 {offsets = [0, 96], sizes = [8, 32], strides = [1, 1]} : vector<8x128xf32> to vector<8x32xf32>
    %120 = arith.mulf %117, %101 : vector<8x32xf32>
    %121 = arith.mulf %116, %118 : vector<8x32xf32>
    %122 = arith.addf %120, %121 : vector<8x32xf32>
    %123 = math.tanh %122 : vector<8x32xf32>
    %124 = arith.mulf %119, %123 : vector<8x32xf32>
    %c32 = arith.constant 32 : index
    %c0_37 = arith.constant 0 : index
    %125 = vector.load %arg7[%c32, %c0_37] : memref<64x32xf32, #tpu.memory_space<vmem>>, vector<8x32xf32>
    tpu.vector_store %arg7[%c32, %c0_37], %124 {strides = array<i32>} : memref<64x32xf32, #tpu.memory_space<vmem>>, vector<8x32xf32>,
    %c5 = arith.constant 5 : index
    %c0_38 = arith.constant 0 : index
    %c0_39 = arith.constant 0 : index
    %126 = vector.load %arg6[%c5, %c0_38, %c0_39] : memref<8x8x128xf32, #tpu.memory_space<vmem>>, vector<1x8x128xf32>
    %127 = vector.shape_cast %126 : vector<1x8x128xf32> to vector<8x128xf32>
    %cst_40 = arith.constant dense<0.000000e+00> : vector<8x128xf32>
    %128 = tpu.matmul %124, %12, %cst_40 {dimension_numbers = #tpu.dot_dimension_numbers<[1], [0], [0], [1], [0, 0, 1, 1], [], []>} : vector<8x32xf32>, vector<32x128xf32>, vector<8x128xf32> -> vector<8x128xf32>
    %129 = arith.addf %127, %128 : vector<8x128xf32>
    %130 = math.tanh %129 : vector<8x128xf32>
    %131 = arith.negf %129 : vector<8x128xf32>
    %132 = math.exp %131 : vector<8x128xf32>
    %cst_41 = arith.constant 1.000000e+00 : f32
    %133 = vector.broadcast %cst_41 : f32 to vector<8x128xf32>
    %134 = arith.addf %133, %132 : vector<8x128xf32>
    %135 = arith.divf %133, %134 : vector<8x128xf32>
    %136 = arith.select %18, %130, %135 : vector<8x128xi1>, vector<8x128xf32>
    %137 = vector.extract_strided_slice %136 {offsets = [0, 0], sizes = [8, 32], strides = [1, 1]} : vector<8x128xf32> to vector<8x32xf32>
    %138 = vector.extract_strided_slice %136 {offsets = [0, 32], sizes = [8, 32], strides = [1, 1]} : vector<8x128xf32> to vector<8x32xf32>
    %139 = vector.extract_strided_slice %136 {offsets = [0, 64], sizes = [8, 32], strides = [1, 1]} : vector<8x128xf32> to vector<8x32xf32>
    %140 = vector.extract_strided_slice %136 {offsets = [0, 96], sizes = [8, 32], strides = [1, 1]} : vector<8x128xf32> to vector<8x32xf32>
    %141 = arith.mulf %138, %122 : vector<8x32xf32>
    %142 = arith.mulf %137, %139 : vector<8x32xf32>
    %143 = arith.addf %141, %142 : vector<8x32xf32>
    %144 = math.tanh %143 : vector<8x32xf32>
    %145 = arith.mulf %140, %144 : vector<8x32xf32>
    %c40 = arith.constant 40 : index
    %c0_42 = arith.constant 0 : index
    %146 = vector.load %arg7[%c40, %c0_42] : memref<64x32xf32, #tpu.memory_space<vmem>>, vector<8x32xf32>
    tpu.vector_store %arg7[%c40, %c0_42], %145 {strides = array<i32>} : memref<64x32xf32, #tpu.memory_space<vmem>>, vector<8x32xf32>,
    %c6 = arith.constant 6 : index
    %c0_43 = arith.constant 0 : index
    %c0_44 = arith.constant 0 : index
    %147 = vector.load %arg6[%c6, %c0_43, %c0_44] : memref<8x8x128xf32, #tpu.memory_space<vmem>>, vector<1x8x128xf32>
    %148 = vector.shape_cast %147 : vector<1x8x128xf32> to vector<8x128xf32>
    %cst_45 = arith.constant dense<0.000000e+00> : vector<8x128xf32>
    %149 = tpu.matmul %145, %12, %cst_45 {dimension_numbers = #tpu.dot_dimension_numbers<[1], [0], [0], [1], [0, 0, 1, 1], [], []>} : vector<8x32xf32>, vector<32x128xf32>, vector<8x128xf32> -> vector<8x128xf32>
    %150 = arith.addf %148, %149 : vector<8x128xf32>
    %151 = math.tanh %150 : vector<8x128xf32>
    %152 = arith.negf %150 : vector<8x128xf32>
    %153 = math.exp %152 : vector<8x128xf32>
    %cst_46 = arith.constant 1.000000e+00 : f32
    %154 = vector.broadcast %cst_46 : f32 to vector<8x128xf32>
    %155 = arith.addf %154, %153 : vector<8x128xf32>
    %156 = arith.divf %154, %155 : vector<8x128xf32>
    %157 = arith.select %18, %151, %156 : vector<8x128xi1>, vector<8x128xf32>
    %158 = vector.extract_strided_slice %157 {offsets = [0, 0], sizes = [8, 32], strides = [1, 1]} : vector<8x128xf32> to vector<8x32xf32>
    %159 = vector.extract_strided_slice %157 {offsets = [0, 32], sizes = [8, 32], strides = [1, 1]} : vector<8x128xf32> to vector<8x32xf32>
    %160 = vector.extract_strided_slice %157 {offsets = [0, 64], sizes = [8, 32], strides = [1, 1]} : vector<8x128xf32> to vector<8x32xf32>
    %161 = vector.extract_strided_slice %157 {offsets = [0, 96], sizes = [8, 32], strides = [1, 1]} : vector<8x128xf32> to vector<8x32xf32>
    %162 = arith.mulf %159, %143 : vector<8x32xf32>
    %163 = arith.mulf %158, %160 : vector<8x32xf32>
    %164 = arith.addf %162, %163 : vector<8x32xf32>
    %165 = math.tanh %164 : vector<8x32xf32>
    %166 = arith.mulf %161, %165 : vector<8x32xf32>
    %c48 = arith.constant 48 : index
    %c0_47 = arith.constant 0 : index
    %167 = vector.load %arg7[%c48, %c0_47] : memref<64x32xf32, #tpu.memory_space<vmem>>, vector<8x32xf32>
    tpu.vector_store %arg7[%c48, %c0_47], %166 {strides = array<i32>} : memref<64x32xf32, #tpu.memory_space<vmem>>, vector<8x32xf32>,
    %c7 = arith.constant 7 : index
    %c0_48 = arith.constant 0 : index
    %c0_49 = arith.constant 0 : index
    %168 = vector.load %arg6[%c7, %c0_48, %c0_49] : memref<8x8x128xf32, #tpu.memory_space<vmem>>, vector<1x8x128xf32>
    %169 = vector.shape_cast %168 : vector<1x8x128xf32> to vector<8x128xf32>
    %cst_50 = arith.constant dense<0.000000e+00> : vector<8x128xf32>
    %170 = tpu.matmul %166, %12, %cst_50 {dimension_numbers = #tpu.dot_dimension_numbers<[1], [0], [0], [1], [0, 0, 1, 1], [], []>} : vector<8x32xf32>, vector<32x128xf32>, vector<8x128xf32> -> vector<8x128xf32>
    %171 = arith.addf %169, %170 : vector<8x128xf32>
    %172 = math.tanh %171 : vector<8x128xf32>
    %173 = arith.negf %171 : vector<8x128xf32>
    %174 = math.exp %173 : vector<8x128xf32>
    %cst_51 = arith.constant 1.000000e+00 : f32
    %175 = vector.broadcast %cst_51 : f32 to vector<8x128xf32>
    %176 = arith.addf %175, %174 : vector<8x128xf32>
    %177 = arith.divf %175, %176 : vector<8x128xf32>
    %178 = arith.select %18, %172, %177 : vector<8x128xi1>, vector<8x128xf32>
    %179 = vector.extract_strided_slice %178 {offsets = [0, 0], sizes = [8, 32], strides = [1, 1]} : vector<8x128xf32> to vector<8x32xf32>
    %180 = vector.extract_strided_slice %178 {offsets = [0, 32], sizes = [8, 32], strides = [1, 1]} : vector<8x128xf32> to vector<8x32xf32>
    %181 = vector.extract_strided_slice %178 {offsets = [0, 64], sizes = [8, 32], strides = [1, 1]} : vector<8x128xf32> to vector<8x32xf32>
    %182 = vector.extract_strided_slice %178 {offsets = [0, 96], sizes = [8, 32], strides = [1, 1]} : vector<8x128xf32> to vector<8x32xf32>
    %183 = arith.mulf %180, %164 : vector<8x32xf32>
    %184 = arith.mulf %179, %181 : vector<8x32xf32>
    %185 = arith.addf %183, %184 : vector<8x32xf32>
    %186 = math.tanh %185 : vector<8x32xf32>
    %187 = arith.mulf %182, %186 : vector<8x32xf32>
    %c56 = arith.constant 56 : index
    %c0_52 = arith.constant 0 : index
    %188 = vector.load %arg7[%c56, %c0_52] : memref<64x32xf32, #tpu.memory_space<vmem>>, vector<8x32xf32>
    tpu.vector_store %arg7[%c56, %c0_52], %187 {strides = array<i32>} : memref<64x32xf32, #tpu.memory_space<vmem>>, vector<8x32xf32>,
    %c0_53 = arith.constant 0 : index
    %c0_54 = arith.constant 0 : index
    %189 = vector.load %arg7[%c0_53, %c0_54] : memref<64x32xf32, #tpu.memory_space<vmem>>, vector<64x32xf32>
    %c0_55 = arith.constant 0 : index
    %c0_56 = arith.constant 0 : index
    %190 = vector.load %arg4[%c0_55, %c0_56] : memref<32x1xf32, #tpu.memory_space<vmem>>, vector<32x1xf32>
    %cst_57 = arith.constant dense<0.000000e+00> : vector<64x1xf32>
    %191 = tpu.matmul %189, %190, %cst_57 {dimension_numbers = #tpu.dot_dimension_numbers<[1], [0], [0], [1], [0, 0, 1, 1], [], []>} : vector<64x32xf32>, vector<32x1xf32>, vector<64x1xf32> -> vector<64x1xf32>
    %192 = vector.shape_cast %191 : vector<64x1xf32> to vector<8x8xf32>
    %c0_58 = arith.constant 0 : index
    %c0_59 = arith.constant 0 : index
    %193 = vector.load %arg5[%c0_58, %c0_59] : memref<8x8xf32, #tpu.memory_space<vmem>>, vector<8x8xf32>
    tpu.vector_store %arg5[%c0_58, %c0_59], %192 {strides = array<i32>} : memref<8x8xf32, #tpu.memory_space<vmem>>, vector<8x8xf32>,
    return
  }
}

</mosaic_0001>

<bundles_post_ra>
// kernel: net_forward.1
= control target key start
LH: loop header
LB: loop body
LE: loop exit
PB: predicated region body
PF: predicated region fallthrough
CT: control target
= control target key end

     0   :  { %v21_v0 = vlaneseq  ;;  %v1504_v1 = vmov 0.0|0.0   ;;  %vm1505_vm0 = vmmov 0   ;;  %v1506_v5 = vmov 0.0   ;;  %s1756_s2 = inlined_call_operand.vmem [shape: f32[32,128], index: 2, kind: input, shape index: {}]   ;;  %s1757_s0 = inlined_call_operand.vmem [shape: f32[8,8], index: 0, kind: input, shape index: {}]   ;;  %s1758_s1 = inlined_call_operand.vmem [shape: f32[1,128], index: 1, kind: input, shape index: {}]   ;;  %s1759_s3 = inlined_call_operand.vmem [shape: f32[1,128], index: 3, kind: input, shape index: {}]   ;;  %s1760_s4 = inlined_call_operand.vmem [shape: f32[32,1], index: 4, kind: input, shape index: {}]   ;;  %s1761_s5 = inlined_call_operand.vmem [shape: f32[8,8], index: 5, kind: output, shape index: {}]  }
   0x1   :  { %1376 = vmatprep.subr.bf16.mxu1 %v1504_v1  ;;  %v115_v2 = vld [vmem:[%s1756_s2] sm:$0xff]  ;;  %v116_v3 = vld [vmem:[%s1756_s2 + $0x8] sm:$0xff]  ;;  %v117_v4 = vld [vmem:[%s1756_s2 + $0x10] sm:$0xff]  ;;  %1276 = vmatprep.mubr.msk.f32.mxu1 %vm1505_vm0, %v1506_v5  ;;  %vm125_vm4 = vcmask 261120   ;;  %vm1170_vm5 = vcmask 1041409   ;;  %vm1172_vm6 = vcmask 1042434  }
   0x2   :  { %v1552_v6 = vpack.c.bf16 %v116_v3, %v115_v2  ;;  %v118_v7 = vld [vmem:[%s1756_s2 + $0x18] sm:$0xff]  ;;  %v1557_v8 = vshrl.u32 %v21_v0, 7  ;;  %1388 = vmatprep.subr.bf16.mxu0 %v1504_v1  ;;  %1298 = vmatprep.mubr.msk.f32.mxu0 %vm1505_vm0, %v1506_v5  ;;  %v1565_v9 = vld [vmem:[%s1757_s0] sm:$0xff]  ;;  %v1598_v24 = vand.u32 127, %v21_v0  ;;  %vm1174_vm7 = vcmask 1043459  }
   0x3   :  { %v1568_v10 = vpack.c.bf16 %v118_v7, %v117_v4  ;;  %v1589_v13 = vld [vmem:[%s1758_s1] ss:$0 sm:$0xff]  ;;  %s1507_s1 = smov 64   ;;  %vm1176_vm8 = vcmask 1044484   ;;  %vm1178_vm9 = vcmask 1045509   ;;  %vm1180_vm10 = vcmask 1046534  }
   0x4   :  { %1378 = vmatpush3.bf16.msra.mxu1 %v1552_v6  ;;  %v23_v11 = vsub.s32 0, %v1557_v8  ;;  %1390 = vmatpush3.bf16.msra.mxu0 %v1552_v6  ;;  %v1595_v16 = vld [vmem:[%s1759_s3] ss:$0 sm:$0xff]  ;;  %vm121_vm1 = vcmp.ge.s32.totalorder %v1598_v24, 64  ;;  %vm122_vm2 = vcmp.lt.s32.totalorder %v1598_v24, 96  ;;  %s1508_s3 = smov 32  }
   0x5   :  { %1379 = vmatprep.subr.bf16.mxu1 %v1504_v1  ;;  %1391 = vmatprep.subr.bf16.mxu0 %v1504_v1  ;;  %vm1602_vm3 = vmand %vm121_vm1, %vm122_vm2  ;;  %v30_v35 = vsub.s32 1, %v1557_v8  ;;  %v37_v58 = vsub.s32 2, %v1557_v8  ;;  %vm1182_vm11 = vcmask 1047559   ;;  %vm1185_vm12 = vcmask 64512  }
   0x6   :  { %v24_v12 = vrot.slane %v1565_v9, %v23_v11 }
   0x7   :  { %v31_v36 = vrot.slane %v1565_v9, %v30_v35  ;;  %v38_v59 = vrot.slane %v1565_v9, %v37_v58 }
   0x8   :  { %1381 = vmatpush3.bf16.msra.mxu1 %v1568_v10  ;;  %26 = vbcast.lane.b32.xlu0 %v24_v12, 256 }
   0x9   :  { %1382 = vmatprep.subr.bf16.mxu1 %v1504_v1  ;;  %1393 = vmatpush3.bf16.msra.mxu0 %v1568_v10 }
   0xa   :  { %1400 = vmatprep.subr.bf16.mxu0 %v1504_v1 }
   0xb   :  { %1277 = vmatmul.mubr.f32.vlgmr.msra.gmra.mrb[0].mxu1 %v1506_v5 }
   0xc   :  { %1384 = vmatpush3.bf16.msra.mxu1 %v1552_v6  ;;  %1287 = vmatprep.mubr.msk.f32.mxu1 %vm1505_vm0, %v1506_v5 }
   0xd   :  { %1385 = vmatprep.subr.bf16.mxu1 %v1504_v1 }
  0x10   :  { %1387 = vmatpush3.bf16.msra.mxu1 %v1568_v10 }
  0x11   :  { %1394 = vmatprep.subr.bf16.mxu1 %v1504_v1 }
  0x7a   :  { %v27_v14 = vpop.permute.xlu0 %26 }
  0x7b   :  { %v84_v15 = vmul.f32 %v1589_v13, %v27_v14 }
  0x7d   :  { %v99_v17 = vadd.f32 %v1595_v16, %v84_v15 }
  0xde   :  { %v195_v18 = vpop.f32.mrb[0].mxu1 }
  0xdf   :  { %v199_v19 = vadd.f32 %v195_v18, %v99_v17  ;;  %v1278_v20 = vpop.f32.mrb[1].mxu1 }
  0xe1   :  { %v1193_v21 = vmul.f32 -1.442695, %v199_v19 }
  0xe3   :  { %1440 = vpow2.f32 %v1193_v21 }
  0xe4   :  { %1442 = vtanh.f32 %v199_v19 }
  0xed   :  { %v1441_v22 = vpop.eup %1440 }
  0xee   :  { %v204_v23 = vadd.f32 1.0, %v1441_v22  ;;  %v1443_v26 = vpop.eup %1442 }
  0xf0   :  { %1444 = vrcp.f32 %v204_v23 }
  0xfa   :  { %v1445_v27 = vpop.eup %1444 }
  0xfb   :  { %v207_v28 = vsel %vm1602_vm3, %v1443_v26, %v1445_v27  ;;  %v44_v27 = vsub.s32 3, %v1557_v8 }
  0xfc   :  { %210 = vrot.lane.b32.xlu0 %v207_v28, %s1507_s1  ;;  %v208_v31 = vmul.f32 0.0, %v207_v28 }
 0x16e   :  { %v211_v29 = vpop.permute.xlu0 %210 }
 0x16f   :  { %v213_v30 = vmul.f32 %v211_v29, %v207_v28 }
 0x171   :  { %215 = vrot.lane.b32.xlu1 %v213_v30, %s1508_s3 }
 0x1e3   :  { %v216_v32 = vpop.permute.xlu1 %215 }
 0x1e4   :  { %v218_v33 = vadd.f32 %v216_v32, %v208_v31 }
 0x1e6   :  { %1446 = vtanh.f32 %v218_v33 }
 0x1f0   :  { %v1447_v34 = vpop.eup %1446 }
 0x1f1   :  { %221 = vrot.lane.b32.xlu1 %v1447_v34, %s1507_s1 }
 0x1f5   :  { %33 = vbcast.lane.b32.xlu1 %v31_v36, 256 }
 0x263   :  { %v222_v37 = vpop.permute.xlu1 %221 }
 0x264   :  { %v224_v38 = vmul.f32 %v222_v37, %v207_v28  ;;  %v45_v28 = vrot.slane %v1565_v9, %v44_v27 }
 0x266   :  { %226 = vrot.lane.b32.xlu0 %v224_v38, %s1508_s3 }
 0x267   :  { %v34_v40 = vpop.permute.xlu1 %33 }
 0x268   :  { %v85_v41 = vmul.f32 %v1589_v13, %v34_v40 }
 0x26a   :  { %v100_v42 = vadd.f32 %v1595_v16, %v85_v41 }
 0x2d8   :  { %v227_v39 = vpop.permute.xlu0 %226 }
 0x2d9   :  { %229 = vst.msk [vmem:[#allocation3] sm:$0xff] %vm125_vm4, %v227_v39  ;;  %1288 = vmatmul.mubr.msk.f32.vlgmr.msra.gmra.mrb[2].mxu1 %vm125_vm4, %v227_v39 }
 0x2da   :  { %1396 = vmatpush3.bf16.msra.mxu1 %v1552_v6  ;;  %1309 = vmatprep.mubr.msk.f32.mxu1 %vm1505_vm0, %v1506_v5 }
 0x2db   :  { %1397 = vmatprep.subr.bf16.mxu1 %v1504_v1 }
 0x2de   :  { %1399 = vmatpush3.bf16.msra.mxu1 %v1568_v10 }
 0x2df   :  { %1406 = vmatprep.subr.bf16.mxu1 %v1504_v1 }
 0x3ac   :  { %v300_v43 = vpop.f32.mrb[2].mxu1 }
 0x3ad   :  { %v304_v44 = vadd.f32 %v300_v43, %v100_v42  ;;  %v1289_v45 = vpop.f32.mrb[3].mxu1 }
 0x3af   :  { %v1195_v46 = vmul.f32 -1.442695, %v304_v44 }
 0x3b1   :  { %1448 = vpow2.f32 %v1195_v46 }
 0x3b2   :  { %1450 = vtanh.f32 %v304_v44 }
 0x3bb   :  { %v1449_v47 = vpop.eup %1448 }
 0x3bc   :  { %v309_v48 = vadd.f32 1.0, %v1449_v47  ;;  %v1451_v49 = vpop.eup %1450 }
 0x3be   :  { %1452 = vrcp.f32 %v309_v48 }
 0x3c8   :  { %v1453_v50 = vpop.eup %1452 }
 0x3c9   :  { %v312_v51 = vsel %vm1602_vm3, %v1451_v49, %v1453_v50  ;;  %v51_v50 = vsub.s32 4, %v1557_v8 }
 0x3ca   :  { %315 = vrot.lane.b32.xlu0 %v312_v51, %s1507_s1  ;;  %v313_v54 = vmul.f32 %v312_v51, %v218_v33 }
 0x43c   :  { %v316_v52 = vpop.permute.xlu0 %315 }
 0x43d   :  { %v318_v53 = vmul.f32 %v316_v52, %v312_v51 }
 0x43f   :  { %320 = vrot.lane.b32.xlu1 %v318_v53, %s1508_s3 }
 0x4b1   :  { %v321_v55 = vpop.permute.xlu1 %320 }
 0x4b2   :  { %v323_v56 = vadd.f32 %v321_v55, %v313_v54 }
 0x4b4   :  { %1454 = vtanh.f32 %v323_v56 }
 0x4be   :  { %v1455_v57 = vpop.eup %1454 }
 0x4bf   :  { %326 = vrot.lane.b32.xlu0 %v1455_v57, %s1507_s1 }
 0x4c3   :  { %40 = vbcast.lane.b32.xlu0 %v38_v59, 256 }
 0x531   :  { %v327_v60 = vpop.permute.xlu0 %326 }
 0x532   :  { %v329_v61 = vmul.f32 %v327_v60, %v312_v51  ;;  %v52_v51 = vrot.slane %v1565_v9, %v51_v50 }
 0x534   :  { %331 = vrot.lane.b32.xlu1 %v329_v61, %s1508_s3 }
 0x535   :  { %v41_v63 = vpop.permute.xlu0 %40 }
 0x536   :  { %v86_v0 = vmul.f32 %v1589_v13, %v41_v63 }
 0x538   :  { %v101_v2 = vadd.f32 %v1595_v16, %v86_v0 }
 0x5a6   :  { %v332_v62 = vpop.permute.xlu1 %331 }
 0x5a7   :  { %334 = vst.msk [vmem:[#allocation3 + $0x8] sm:$0xff] %vm125_vm4, %v332_v62  ;;  %1299 = vmatmul.mubr.msk.f32.vlgmr.msra.gmra.mrb[0].mxu0 %vm125_vm4, %v332_v62 }
 0x5a8   :  { %1402 = vmatpush3.bf16.msra.mxu0 %v1552_v6  ;;  %1320 = vmatprep.mubr.msk.f32.mxu0 %vm1505_vm0, %v1506_v5 }
 0x5a9   :  { %1403 = vmatprep.subr.bf16.mxu0 %v1504_v1 }
 0x5ac   :  { %1405 = vmatpush3.bf16.msra.mxu0 %v1568_v10 }
 0x5ad   :  { %1412 = vmatprep.subr.bf16.mxu0 %v1504_v1 }
 0x5ae   :  { %v966_v50 = vld [vmem:[#allocation3 + $0x8] sm:$0xff] }
 0x67a   :  { %v405_v3 = vpop.f32.mrb[0].mxu0 }
 0x67b   :  { %v409_v4 = vadd.f32 %v405_v3, %v101_v2  ;;  %v1300_v7 = vpop.f32.mrb[1].mxu0 }
 0x67d   :  { %v1197_v11 = vmul.f32 -1.442695, %v409_v4 }
 0x67f   :  { %1456 = vpow2.f32 %v1197_v11 }
 0x680   :  { %1458 = vtanh.f32 %v409_v4 }
 0x689   :  { %v1457_v12 = vpop.eup %1456 }
 0x68a   :  { %v414_v14 = vadd.f32 1.0, %v1457_v12  ;;  %v1459_v15 = vpop.eup %1458 }
 0x68c   :  { %1460 = vrcp.f32 %v414_v14 }
 0x696   :  { %v1461_v17 = vpop.eup %1460 }
 0x697   :  { %v417_v18 = vsel %vm1602_vm3, %v1459_v15, %v1461_v17  ;;  %v58_v17 = vsub.s32 5, %v1557_v8 }
 0x698   :  { %420 = vrot.lane.b32.xlu1 %v417_v18, %s1507_s1  ;;  %v418_v21 = vmul.f32 %v417_v18, %v323_v56 }
 0x70a   :  { %v421_v19 = vpop.permute.xlu1 %420 }
 0x70b   :  { %v423_v20 = vmul.f32 %v421_v19, %v417_v18 }
 0x70d   :  { %425 = vrot.lane.b32.xlu0 %v423_v20, %s1508_s3 }
 0x77f   :  { %v426_v22 = vpop.permute.xlu0 %425 }
 0x780   :  { %v428_v23 = vadd.f32 %v426_v22, %v418_v21 }
 0x782   :  { %1462 = vtanh.f32 %v428_v23 }
 0x78c   :  { %v1463_v26 = vpop.eup %1462 }
 0x78d   :  { %431 = vrot.lane.b32.xlu1 %v1463_v26, %s1507_s1 }
 0x791   :  { %47 = vbcast.lane.b32.xlu1 %v45_v28, 256 }
 0x7ff   :  { %v432_v29 = vpop.permute.xlu1 %431 }
 0x800   :  { %v434_v30 = vmul.f32 %v432_v29, %v417_v18  ;;  %v59_v18 = vrot.slane %v1565_v9, %v58_v17 }
 0x802   :  { %436 = vrot.lane.b32.xlu0 %v434_v30, %s1508_s3 }
 0x803   :  { %v48_v32 = vpop.permute.xlu1 %47 }
 0x804   :  { %v87_v33 = vmul.f32 %v1589_v13, %v48_v32 }
 0x806   :  { %v102_v34 = vadd.f32 %v1595_v16, %v87_v33 }
 0x874   :  { %v437_v31 = vpop.permute.xlu0 %436 }
 0x875   :  { %439 = vst.msk [vmem:[#allocation3 + $0x10] sm:$0xff] %vm125_vm4, %v437_v31  ;;  %1310 = vmatmul.mubr.msk.f32.vlgmr.msra.gmra.mrb[4].mxu1 %vm125_vm4, %v437_v31 }
 0x876   :  { %1408 = vmatpush3.bf16.msra.mxu1 %v1552_v6  ;;  %1331 = vmatprep.mubr.msk.f32.mxu1 %vm1505_vm0, %v1506_v5 }
 0x877   :  { %1409 = vmatprep.subr.bf16.mxu1 %v1504_v1 }
 0x87a   :  { %1411 = vmatpush3.bf16.msra.mxu1 %v1568_v10 }
 0x87b   :  { %1418 = vmatprep.subr.bf16.mxu1 %v1504_v1 }
 0x948   :  { %v510_v35 = vpop.f32.mrb[4].mxu1 }
 0x949   :  { %v514_v36 = vadd.f32 %v510_v35, %v102_v34  ;;  %v1311_v37 = vpop.f32.mrb[5].mxu1 }
 0x94a   :  { %v973_v37 = vld [vmem:[%s1760_s4] sm:$0xff] }
 0x94b   :  { %v1199_v38 = vmul.f32 -1.442695, %v514_v36 }
 0x94d   :  { %1464 = vpow2.f32 %v1199_v38  ;;  %v974_v38 = vld [vmem:[%s1760_s4 + $0x8] sm:$0xff] }
 0x94e   :  { %1466 = vtanh.f32 %v514_v36 }
 0x957   :  { %v1465_v39 = vpop.eup %1464 }
 0x958   :  { %v519_v40 = vadd.f32 1.0, %v1465_v39  ;;  %v1467_v41 = vpop.eup %1466  ;;  %v1424_v39 = vpack.c.bf16 %v974_v38, %v973_v37 }
 0x95a   :  { %1468 = vrcp.f32 %v519_v40 }
 0x964   :  { %v1469_v42 = vpop.eup %1468 }
 0x965   :  { %v522_v43 = vsel %vm1602_vm3, %v1467_v41, %v1469_v42 }
 0x966   :  { %525 = vrot.lane.b32.xlu0 %v522_v43, %s1507_s1  ;;  %v523_v46 = vmul.f32 %v522_v43, %v428_v23 }
 0x9d8   :  { %v526_v44 = vpop.permute.xlu0 %525 }
 0x9d9   :  { %v528_v45 = vmul.f32 %v526_v44, %v522_v43 }
 0x9db   :  { %530 = vrot.lane.b32.xlu1 %v528_v45, %s1508_s3  ;;  %v975_v45 = vld [vmem:[%s1760_s4 + $0x10] sm:$0xff] }
 0xa4d   :  { %v531_v47 = vpop.permute.xlu1 %530 }
 0xa4e   :  { %v533_v48 = vadd.f32 %v531_v47, %v523_v46  ;;  %v976_v46 = vld [vmem:[%s1760_s4 + $0x18] sm:$0xff] }
 0xa4f   :  { %v1428_v47 = vpack.c.bf16 %v976_v46, %v975_v45 }
 0xa50   :  { %1470 = vtanh.f32 %v533_v48 }
 0xa5a   :  { %v1471_v49 = vpop.eup %1470 }
 0xa5b   :  { %536 = vrot.lane.b32.xlu0 %v1471_v49, %s1507_s1  ;;  %v965_v49 = vld [vmem:[#allocation3] sm:$0xff] }
 0xa5f   :  { %54 = vbcast.lane.b32.xlu0 %v52_v51, 256  ;;  %v967_v51 = vld [vmem:[#allocation3 + $0x10] sm:$0xff] }
 0xacd   :  { %v537_v52 = vpop.permute.xlu0 %536 }
 0xace   :  { %v539_v53 = vmul.f32 %v537_v52, %v522_v43  ;;  %v65_v43 = vsub.s32 6, %v1557_v8 }
 0xad0   :  { %541 = vrot.lane.b32.xlu1 %v539_v53, %s1508_s3  ;;  %v66_v44 = vrot.slane %v1565_v9, %v65_v43 }
 0xad1   :  { %v55_v55 = vpop.permute.xlu0 %54 }
 0xad2   :  { %v88_v56 = vmul.f32 %v1589_v13, %v55_v55 }
 0xad4   :  { %v103_v57 = vadd.f32 %v1595_v16, %v88_v56 }
 0xb42   :  { %v542_v54 = vpop.permute.xlu1 %541 }
 0xb43   :  { %544 = vst.msk [vmem:[#allocation3 + $0x18] sm:$0xff] %vm125_vm4, %v542_v54  ;;  %1321 = vmatmul.mubr.msk.f32.vlgmr.msra.gmra.mrb[2].mxu0 %vm125_vm4, %v542_v54 }
 0xb44   :  { %1414 = vmatpush3.bf16.msra.mxu0 %v1552_v6  ;;  %1342 = vmatprep.mubr.msk.f32.mxu0 %vm1505_vm0, %v1506_v5 }
 0xb45   :  { %1415 = vmatprep.subr.bf16.mxu0 %v1504_v1 }
 0xb48   :  { %1417 = vmatpush3.bf16.msra.mxu0 %v1568_v10 }
 0xb49   :  { %1425 = vmatprep.subr.bf16.mxu0 %v1424_v39 }
 0xb4a   :  { %v968_v52 = vld [vmem:[#allocation3 + $0x18] sm:$0xff] }
 0xc16   :  { %v615_v58 = vpop.f32.mrb[2].mxu0 }
 0xc17   :  { %v619_v59 = vadd.f32 %v615_v58, %v103_v57  ;;  %v1322_v60 = vpop.f32.mrb[3].mxu0 }
 0xc19   :  { %v1201_v61 = vmul.f32 -1.442695, %v619_v59 }
 0xc1b   :  { %1472 = vpow2.f32 %v1201_v61 }
 0xc1c   :  { %1474 = vtanh.f32 %v619_v59 }
 0xc25   :  { %v1473_v62 = vpop.eup %1472 }
 0xc26   :  { %v624_v63 = vadd.f32 1.0, %v1473_v62  ;;  %v1475_v0 = vpop.eup %1474 }
 0xc28   :  { %1476 = vrcp.f32 %v624_v63 }
 0xc32   :  { %v1477_v2 = vpop.eup %1476 }
 0xc33   :  { %v627_v3 = vsel %vm1602_vm3, %v1475_v0, %v1477_v2 }
 0xc34   :  { %630 = vrot.lane.b32.xlu1 %v627_v3, %s1507_s1  ;;  %v628_v11 = vmul.f32 %v627_v3, %v533_v48 }
 0xca6   :  { %v631_v4 = vpop.permute.xlu1 %630 }
 0xca7   :  { %v633_v7 = vmul.f32 %v631_v4, %v627_v3 }
 0xca9   :  { %635 = vrot.lane.b32.xlu0 %v633_v7, %s1508_s3 }
 0xd1b   :  { %v636_v12 = vpop.permute.xlu0 %635 }
 0xd1c   :  { %v638_v14 = vadd.f32 %v636_v12, %v628_v11 }
 0xd1e   :  { %1478 = vtanh.f32 %v638_v14 }
 0xd28   :  { %v1479_v15 = vpop.eup %1478 }
 0xd29   :  { %641 = vrot.lane.b32.xlu1 %v1479_v15, %s1507_s1 }
 0xd2d   :  { %61 = vbcast.lane.b32.xlu1 %v59_v18, 256 }
 0xd9b   :  { %v642_v19 = vpop.permute.xlu1 %641 }
 0xd9c   :  { %v644_v20 = vmul.f32 %v642_v19, %v627_v3 }
 0xd9e   :  { %646 = vrot.lane.b32.xlu0 %v644_v20, %s1508_s3 }
 0xd9f   :  { %v62_v22 = vpop.permute.xlu1 %61 }
 0xda0   :  { %v89_v23 = vmul.f32 %v1589_v13, %v62_v22 }
 0xda2   :  { %v104_v26 = vadd.f32 %v1595_v16, %v89_v23  ;;  %v72_v23 = vsub.s32 7, %v1557_v8 }
 0xe10   :  { %v647_v21 = vpop.permute.xlu0 %646 }
 0xe11   :  { %649 = vst.msk [vmem:[#allocation3 + $0x20] sm:$0xff] %vm125_vm4, %v647_v21  ;;  %1332 = vmatmul.mubr.msk.f32.vlgmr.msra.gmra.mrb[6].mxu1 %vm125_vm4, %v647_v21 }
 0xe12   :  { %1420 = vmatpush3.bf16.msra.mxu1 %v1552_v6  ;;  %1353 = vmatprep.mubr.msk.f32.mxu1 %vm1505_vm0, %v1506_v5 }
 0xe13   :  { %1421 = vmatprep.subr.bf16.mxu1 %v1504_v1 }
 0xe16   :  { %1423 = vmatpush3.bf16.msra.mxu1 %v1568_v10 }
 0xe18   :  { %v969_v53 = vld [vmem:[#allocation3 + $0x20] sm:$0xff] }
 0xee4   :  { %v720_v27 = vpop.f32.mrb[6].mxu1 }
 0xee5   :  { %v724_v28 = vadd.f32 %v720_v27, %v104_v26  ;;  %v1333_v29 = vpop.f32.mrb[7].mxu1  ;;  %v73_v27 = vrot.slane %v1565_v9, %v72_v23 }
 0xee7   :  { %v1203_v30 = vmul.f32 -1.442695, %v724_v28 }
 0xee9   :  { %1480 = vpow2.f32 %v1203_v30 }
 0xeea   :  { %1482 = vtanh.f32 %v724_v28 }
 0xef3   :  { %v1481_v31 = vpop.eup %1480 }
 0xef4   :  { %v729_v32 = vadd.f32 1.0, %v1481_v31  ;;  %v1483_v6 = vpop.eup %1482 }
 0xef6   :  { %1484 = vrcp.f32 %v729_v32 }
 0xf00   :  { %v1485_v5 = vpop.eup %1484 }
 0xf01   :  { %v732_v1 = vsel %vm1602_vm3, %v1483_v6, %v1485_v5 }
 0xf02   :  { %735 = vrot.lane.b32.xlu0 %v732_v1, %s1507_s1  ;;  %v733_v34 = vmul.f32 %v732_v1, %v638_v14 }
 0xf74   :  { %v736_v10 = vpop.permute.xlu0 %735 }
 0xf75   :  { %v738_v33 = vmul.f32 %v736_v10, %v732_v1 }
 0xf77   :  { %740 = vrot.lane.b32.xlu1 %v738_v33, %s1508_s3 }
 0xfe9   :  { %v741_v35 = vpop.permute.xlu1 %740 }
 0xfea   :  { %v743_v36 = vadd.f32 %v741_v35, %v733_v34 }
 0xfec   :  { %1486 = vtanh.f32 %v743_v36 }
 0xff6   :  { %v1487_v40 = vpop.eup %1486 }
 0xff7   :  { %746 = vrot.lane.b32.xlu0 %v1487_v40, %s1507_s1 }
 0xffb   :  { %68 = vbcast.lane.b32.xlu0 %v66_v44, 256 }
0x1069   :  { %v747_v41 = vpop.permute.xlu0 %746 }
0x106a   :  { %v749_v42 = vmul.f32 %v747_v41, %v732_v1 }
0x106c   :  { %751 = vrot.lane.b32.xlu1 %v749_v42, %s1508_s3 }
0x106d   :  { %v69_v55 = vpop.permute.xlu0 %68 }
0x106e   :  { %v90_v56 = vmul.f32 %v1589_v13, %v69_v55 }
0x1070   :  { %v105_v57 = vadd.f32 %v1595_v16, %v90_v56 }
0x10de   :  { %v752_v48 = vpop.permute.xlu1 %751 }
0x10df   :  { %754 = vst.msk [vmem:[#allocation3 + $0x28] sm:$0xff] %vm125_vm4, %v752_v48  ;;  %1343 = vmatmul.mubr.msk.f32.vlgmr.msra.gmra.mrb[4].mxu0 %vm125_vm4, %v752_v48 }
0x10e0   :  { %1427 = vmatpush3.bf16.msra.mxu0 %v1424_v39  ;;  %1364 = vmatprep.mubr.msk.f32.mxu0 %vm125_vm4, %v965_v49 }
0x10e1   :  { %1429 = vmatprep.subr.bf16.mxu0 %v1428_v47 }
0x10e4   :  { %1431 = vmatpush3.bf16.msra.mxu0 %v1428_v47 }
0x10e6   :  { %v970_v54 = vld [vmem:[#allocation3 + $0x28] sm:$0xff] }
0x10e7   :  { %1365 = vmatmul.mubr.msk.f32.vlgmr.msra.gmra.mrb[6].mxu0 %vm125_vm4, %v966_v50 }
0x10e8   :  { %1367 = vmatprep.mubr.msk.f32.mxu0 %vm125_vm4, %v967_v51  ;;  %v1140_v51 = vsub.s32 %v1598_v24, %v1557_v8 }
0x10eb   :  { %1368 = vmatmul.mubr.msk.f32.gmra.mrb[8].mxu0 %vm125_vm4, %v968_v52 }
0x10ec   :  { %1370 = vmatprep.mubr.msk.f32.mxu0 %vm125_vm4, %v969_v53 }
0x10ef   :  { %1371 = vmatmul.mubr.msk.f32.gmra.mrb[10].mxu0 %vm125_vm4, %v970_v54 }
0x11b2   :  { %v825_v58 = vpop.f32.mrb[4].mxu0 }
0x11b3   :  { %v829_v59 = vadd.f32 %v825_v58, %v105_v57  ;;  %v1344_v60 = vpop.f32.mrb[5].mxu0 }
0x11b5   :  { %v1205_v61 = vmul.f32 -1.442695, %v829_v59 }
0x11b7   :  { %1488 = vpow2.f32 %v1205_v61 }
0x11b8   :  { %1490 = vtanh.f32 %v829_v59 }
0x11ba   :  { %v1724_v62 = vpop.f32.mrb[6].mxu0 }
0x11bb   :  { %v1067_v63 = vpop.f32.mrb[7].mxu0 }
0x11be   :  { %v1369_v0 = vpop.f32.mrb[8].mxu0 }
0x11bf   :  { %v1726_v2 = vpop.f32.mrb[9].mxu0 }
0x11c1   :  { %v1489_v3 = vpop.eup %1488 }
0x11c2   :  { %v834_v4 = vadd.f32 1.0, %v1489_v3  ;;  %v1372_v7 = vpop.f32.mrb[10].mxu0  ;;  %v1491_v12 = vpop.eup %1490 }
0x11c3   :  { %v1087_v11 = vpop.f32.mrb[11].mxu0 }
0x11c4   :  { %1492 = vrcp.f32 %v834_v4 }
0x11ce   :  { %v1493_v14 = vpop.eup %1492 }
0x11cf   :  { %v837_v15 = vsel %vm1602_vm3, %v1491_v12, %v1493_v14 }
0x11d0   :  { %840 = vrot.lane.b32.xlu1 %v837_v15, %s1507_s1  ;;  %v838_v19 = vmul.f32 %v837_v15, %v743_v36 }
0x1242   :  { %v841_v17 = vpop.permute.xlu1 %840 }
0x1243   :  { %v843_v18 = vmul.f32 %v841_v17, %v837_v15 }
0x1245   :  { %845 = vrot.lane.b32.xlu0 %v843_v18, %s1508_s3 }
0x12b7   :  { %v846_v20 = vpop.permute.xlu0 %845 }
0x12b8   :  { %v848_v21 = vadd.f32 %v846_v20, %v838_v19 }
0x12ba   :  { %1494 = vtanh.f32 %v848_v21 }
0x12c4   :  { %v1495_v22 = vpop.eup %1494 }
0x12c5   :  { %851 = vrot.lane.b32.xlu1 %v1495_v22, %s1507_s1 }
0x12c9   :  { %75 = vbcast.lane.b32.xlu1 %v73_v27, 256 }
0x1337   :  { %v852_v26 = vpop.permute.xlu1 %851 }
0x1338   :  { %v854_v28 = vmul.f32 %v852_v26, %v837_v15 }
0x133a   :  { %856 = vrot.lane.b32.xlu0 %v854_v28, %s1508_s3 }
0x133b   :  { %v76_v31 = vpop.permute.xlu1 %75 }
0x133c   :  { %v91_v32 = vmul.f32 %v1589_v13, %v76_v31 }
0x133e   :  { %v106_v6 = vadd.f32 %v1595_v16, %v91_v32  ;;  %v1509_v16 = vmov 0  }
0x133f   :  { %1438 = vset.pattern.permute.xlu0 %v1509_v16  ;;  %1439 = vset.pattern.permute.xlu1 %v1509_v16 }
0x13ac   :  { %v857_v29 = vpop.permute.xlu0 %856 }
0x13ad   :  { %859 = vst.msk [vmem:[#allocation3 + $0x30] sm:$0xff] %vm125_vm4, %v857_v29  ;;  %1354 = vmatmul.mubr.msk.f32.vlgmr.msra.gmra.mrb[8].mxu1 %vm125_vm4, %v857_v29 }
0x13b4   :  { %v971_v30 = vld [vmem:[#allocation3 + $0x30] sm:$0xff] }
0x13b5   :  { %1373 = vmatprep.mubr.msk.f32.mxu0 %vm125_vm4, %v971_v30 }
0x1480   :  { %v930_v5 = vpop.f32.mrb[8].mxu1 }
0x1481   :  { %v934_v1 = vadd.f32 %v930_v5, %v106_v6  ;;  %v1355_v9 = vpop.f32.mrb[9].mxu1 }
0x1483   :  { %v1207_v10 = vmul.f32 -1.442695, %v934_v1 }
0x1485   :  { %1496 = vpow2.f32 %v1207_v10 }
0x1486   :  { %1498 = vtanh.f32 %v934_v1 }
0x148f   :  { %v1497_v33 = vpop.eup %1496 }
0x1490   :  { %v939_v34 = vadd.f32 1.0, %v1497_v33  ;;  %v1499_v35 = vpop.eup %1498 }
0x1492   :  { %1500 = vrcp.f32 %v939_v34 }
0x149c   :  { %v1501_v36 = vpop.eup %1500 }
0x149d   :  { %v942_v37 = vsel %vm1602_vm3, %v1499_v35, %v1501_v36 }
0x149e   :  { %945 = vrot.lane.b32.xlu0 %v942_v37, %s1507_s1  ;;  %v943_v39 = vmul.f32 %v942_v37, %v848_v21 }
0x1510   :  { %v946_v38 = vpop.permute.xlu0 %945 }
0x1511   :  { %v948_v13 = vmul.f32 %v946_v38, %v942_v37 }
0x1513   :  { %950 = vrot.lane.b32.xlu1 %v948_v13, %s1508_s3 }
0x1585   :  { %v951_v40 = vpop.permute.xlu1 %950 }
0x1586   :  { %v953_v41 = vadd.f32 %v951_v40, %v943_v39 }
0x1588   :  { %1502 = vtanh.f32 %v953_v41 }
0x1592   :  { %v1503_v42 = vpop.eup %1502 }
0x1593   :  { %956 = vrot.lane.b32.xlu0 %v1503_v42, %s1507_s1 }
0x1597   :  { %1115 = vperm.xlu0 %1438, %v1067_v63  }
0x159b   :  { %1124 = vperm.xlu0 %1438, %v1369_v0  }
0x159f   :  { %1130 = vperm.xlu0 %1438, %v1372_v7  }
0x1605   :  { %v957_v25 = vpop.permute.xlu0 %956 }
0x1606   :  { %v959_v43 = vmul.f32 %v957_v25, %v942_v37 }
0x1608   :  { %961 = vrot.lane.b32.xlu1 %v959_v43, %s1508_s3 }
0x160c   :  { %1118 = vperm.xlu1 %1439, %v1724_v62  }
0x1610   :  { %1121 = vperm.xlu1 %1439, %v1726_v2  }
0x1614   :  { %1127 = vperm.xlu1 %1439, %v1087_v11  }
0x1616   :  { %v1116_v49 = vpop.permute.xlu0 %1115 }
0x1617   :  { %v1141_v55 = vrot.slane %v1116_v49, %v1140_v51 }
0x161a   :  { %v1125_v52 = vpop.permute.xlu0 %1124 }
0x161b   :  { %v1153_v61 = vrot.slane %v1125_v52, %v1140_v51 }
0x161e   :  { %v1131_v58 = vpop.permute.xlu0 %1130 }
0x161f   :  { %v1161_v2 = vrot.slane %v1131_v58, %v1140_v51 }
0x167a   :  { %v962_v44 = vpop.permute.xlu1 %961 }
0x167b   :  { %964 = vst.msk [vmem:[#allocation3 + $0x38] sm:$0xff] %vm125_vm4, %v962_v44 }
0x1682   :  { %v972_v45 = vld [vmem:[#allocation3 + $0x38] sm:$0xff] }
0x1683   :  { %1374 = vmatmul.mubr.msk.f32.gmra.mrb[12].mxu0 %vm125_vm4, %v972_v45 }
0x168b   :  { %v1119_v48 = vpop.permute.xlu1 %1118 }
0x168c   :  { %v1145_v53 = vrot.slane %v1119_v48, %v1140_v51 }
0x168e   :  { %v1171_v57 = vsel %vm1170_vm5, %v1145_v53, %v1141_v55 }
0x168f   :  { %v1122_v50 = vpop.permute.xlu1 %1121 }
0x1690   :  { %v1149_v54 = vrot.slane %v1122_v50, %v1140_v51 }
0x1692   :  { %v1173_v59 = vsel %vm1172_vm6, %v1149_v54, %v1171_v57 }
0x1693   :  { %v1128_v56 = vpop.permute.xlu1 %1127  ;;  %v1175_v62 = vsel %vm1174_vm7, %v1153_v61, %v1173_v59 }
0x1694   :  { %v1157_v60 = vrot.slane %v1128_v56, %v1140_v51 }
0x1696   :  { %v1177_v63 = vsel %vm1176_vm8, %v1157_v60, %v1175_v62 }
0x1697   :  { %v1179_v4 = vsel %vm1178_vm9, %v1161_v2, %v1177_v63 }
0x1756   :  { %v1375_v46 = vpop.f32.mrb[12].mxu0 }
0x1757   :  { %1136 = vperm.xlu0 %1438, %v1375_v46   ;;  %v1097_v47 = vpop.f32.mrb[13].mxu0 }
0x1758   :  { %1133 = vperm.xlu1 %1439, %v1097_v47  }
0x17d6   :  { %v1137_v0 = vpop.permute.xlu0 %1136 }
0x17d7   :  { %v1134_v8 = vpop.permute.xlu1 %1133  ;;  %v1169_v3 = vrot.slane %v1137_v0, %v1140_v51 }
0x17d8   :  { %v1165_v24 = vrot.slane %v1134_v8, %v1140_v51 }
0x17da   :  { %v1181_v7 = vsel %vm1180_vm10, %v1165_v24, %v1179_v4 }
0x17db   :  { %v1183_v11 = vsel %vm1182_vm11, %v1169_v3, %v1181_v7 }
0x17dc   :  { %1186 = vst.msk [vmem:[%s1761_s5] sm:$0xff] %vm1185_vm12, %v1183_v11 }

</bundles_post_ra>
